<compile_context>
chip_gen: v6e
topology: v6e:2x2x1
jax: 0.10.0
libtpu: 0.0.40
codegen_flags: <defaults>
</compile_context>

<pallas_src>
import functools

import jax
import jax.numpy as jnp
from jax.experimental import pallas as pl
from jax.experimental.pallas import tpu as pltpu


def _round_up(x, m):
    return (x + m - 1) // m * m


def actor_kernel(x_ref, w1_ref, b1_ref, w2_ref, b2_ref, out_ref, *, action_max):
    # Layer 1: Linear + ReLU  (MXU matmul, f32 accumulate; bias broadcast + ReLU on VPU)
    h = jnp.dot(x_ref[...], w1_ref[...], preferred_element_type=jnp.float32)
    h = jnp.maximum(h + b1_ref[...], 0.0)
    # Layer 2: Linear into the lane-dense (padded-to-128) output width.
    mu = jnp.dot(h, w2_ref[...], preferred_element_type=jnp.float32)
    mu = mu + b2_ref[...]
    # action_max * tanh(mu): tanh on EUP, scale co-issues on VPU (kept in-kernel).
    out_ref[...] = (action_max * jnp.tanh(mu)).astype(out_ref.dtype)


def actor_forward(state, w1, b1, w2, b2, action_max, *, tile_b=128):
    """Pallas-backed ActorNetwork.forward.

    state: (B, state_dim) f32
    w1:    (state_dim, hidden) f32, b1: (1, hidden)
    w2:    (hidden, action_dim) f32, b2: (1, action_dim)
    returns (B, action_dim) f32 == action_max * tanh(relu(state @ w1 + b1) @ w2 + b2)
    """
    B, state_dim = state.shape
    hidden = w1.shape[1]
    action_dim = w2.shape[1]

    # --- trace-time zero padding (outside the kernel) ------------------------
    k_pad = _round_up(max(state_dim, 8), 32)          # sublane-aligned contraction
    n_pad = _round_up(max(action_dim, 128), 128)      # lane-dense output width
    tb = min(tile_b, _round_up(B, 8))                 # batch tile (multiple of 8)
    b_pad = _round_up(B, tb)

    x_p = jnp.zeros((b_pad, k_pad), state.dtype).at[:B, :state_dim].set(state)
    w1_p = jnp.zeros((k_pad, hidden), w1.dtype).at[:state_dim, :].set(w1)
    w2_p = jnp.zeros((hidden, n_pad), w2.dtype).at[:, :action_dim].set(w2)
    b2_p = jnp.zeros((1, n_pad), b2.dtype).at[:, :action_dim].set(b2)

    kernel = functools.partial(actor_kernel, action_max=float(action_max))

    out_p = pl.pallas_call(
        kernel,
        out_shape=jax.ShapeDtypeStruct((b_pad, n_pad), jnp.float32),
        grid=(b_pad // tb,),
        in_specs=[
            pl.BlockSpec((tb, k_pad), lambda i: (i, 0)),      # streamed batch tile
            pl.BlockSpec((k_pad, hidden), lambda i: (0, 0)),  # weights resident in VMEM
            pl.BlockSpec((1, hidden), lambda i: (0, 0)),
            pl.BlockSpec((hidden, n_pad), lambda i: (0, 0)),
            pl.BlockSpec((1, n_pad), lambda i: (0, 0)),
        ],
        out_specs=pl.BlockSpec((tb, n_pad), lambda i: (i, 0)),
        compiler_params=pltpu.CompilerParams(
            dimension_semantics=("parallel",),                # megacore / v7x 2nd TC
        ),
    )(x_p, w1_p, b1, w2_p, b2_p)

    return out_p[:B, :action_dim]


def init_params(key, state_dim, hidden, action_dim):
    """Deterministic init mimicking torch.nn.Linear default (U[-1/sqrt(fan_in), +])."""
    k1, k2, k3, k4 = jax.random.split(key, 4)
    bound1 = 1.0 / jnp.sqrt(jnp.float32(state_dim))
    bound2 = 1.0 / jnp.sqrt(jnp.float32(hidden))
    w1 = jax.random.uniform(k1, (state_dim, hidden), jnp.float32, -bound1, bound1)
    b1 = jax.random.uniform(k2, (1, hidden), jnp.float32, -bound1, bound1)
    w2 = jax.random.uniform(k3, (hidden, action_dim), jnp.float32, -bound2, bound2)
    b2 = jax.random.uniform(k4, (1, action_dim), jnp.float32, -bound2, bound2)
    return w1, b1, w2, b2


if __name__ == "__main__":
    # BipedalWalker dims: state_dim=24, action_dim=4, hidden=128.
    # Batch of 256 states (e.g. a replay-buffer minibatch) -> 2 grid tiles of 128.
    batch, state_dim, hidden, action_dim = 256, 24, 128, 4
    action_max = 1.0

    key = jax.random.PRNGKey(0)
    k_state, k_params = jax.random.split(key)
    state = jax.random.normal(k_state, (batch, state_dim), jnp.float32)
    w1, b1, w2, b2 = init_params(k_params, state_dim, hidden, action_dim)

    mu = actor_forward(state, w1, b1, w2, b2, action_max)
    mu = jax.block_until_ready(mu)

    # Pure-JAX reference check.
    h_ref = jnp.maximum(state @ w1 + b1, 0.0)
    mu_ref = action_max * jnp.tanh(h_ref @ w2 + b2)
    assert mu.shape == (batch, action_dim)
    assert jnp.allclose(mu, mu_ref, atol=1e-5, rtol=1e-5)

    print("KERNEL_OK")
</pallas_src>

<mosaic_0001>
module attributes {stable_mosaic.version = 11 : i64} {
  func.func @actor_kernel(%arg0: i32, %arg1: memref<128x32xf32, #tpu.memory_space<vmem>>, %arg2: memref<32x128xf32, #tpu.memory_space<vmem>>, %arg3: memref<1x128xf32, #tpu.memory_space<vmem>>, %arg4: memref<128x128xf32, #tpu.memory_space<vmem>>, %arg5: memref<1x128xf32, #tpu.memory_space<vmem>>, %arg6: memref<128x128xf32, #tpu.memory_space<vmem>>) attributes {dimension_semantics = [#tpu.dimension_semantics<parallel>], iteration_bounds = array<i64: 2>, scalar_prefetch = 0 : i64, scratch_operands = 0 : i64, tpu.core_type = #tpu.core_type<tc>, window_params = [{transform_indices = @transform_0, window_bounds = array<i64: 128, 32>}, {pipeline_mode = #tpu.pipeline_mode<synchronous>, transform_indices = @transform_1, window_bounds = array<i64: 32, 128>}, {pipeline_mode = #tpu.pipeline_mode<synchronous>, transform_indices = @transform_2, window_bounds = array<i64: 1, 128>}, {pipeline_mode = #tpu.pipeline_mode<synchronous>, transform_indices = @transform_3, window_bounds = array<i64: 128, 128>}, {pipeline_mode = #tpu.pipeline_mode<synchronous>, transform_indices = @transform_4, window_bounds = array<i64: 1, 128>}, {transform_indices = @transform_5, window_bounds = array<i64: 128, 128>}]} {
    %c0 = arith.constant 0 : index
    %c0_0 = arith.constant 0 : index
    %0 = vector.load %arg1[%c0, %c0_0] : memref<128x32xf32, #tpu.memory_space<vmem>>, vector<128x32xf32>
    %c0_1 = arith.constant 0 : index
    %c0_2 = arith.constant 0 : index
    %1 = vector.load %arg2[%c0_1, %c0_2] : memref<32x128xf32, #tpu.memory_space<vmem>>, vector<32x128xf32>
    %cst = arith.constant dense<0.000000e+00> : vector<128x128xf32>
    %2 = tpu.matmul %0, %1, %cst {dimension_numbers = #tpu.dot_dimension_numbers<[1], [0], [0], [1], [0, 0, 1, 1], [], []>} : vector<128x32xf32>, vector<32x128xf32>, vector<128x128xf32> -> vector<128x128xf32>
    %c0_3 = arith.constant 0 : index
    %c0_4 = arith.constant 0 : index
    %3 = vector.load %arg3[%c0_3, %c0_4] : memref<1x128xf32, #tpu.memory_space<vmem>>, vector<1x128xf32>
    %4 = vector.broadcast %3 : vector<1x128xf32> to vector<128x128xf32>
    %5 = arith.addf %2, %4 : vector<128x128xf32>
    %cst_5 = arith.constant 0.000000e+00 : f32
    %6 = vector.broadcast %cst_5 : f32 to vector<128x128xf32>
    %7 = arith.maximumf %5, %6 : vector<128x128xf32>
    %c0_6 = arith.constant 0 : index
    %c0_7 = arith.constant 0 : index
    %8 = vector.load %arg4[%c0_6, %c0_7] : memref<128x128xf32, #tpu.memory_space<vmem>>, vector<128x128xf32>
    %cst_8 = arith.constant dense<0.000000e+00> : vector<128x128xf32>
    %9 = tpu.matmul %7, %8, %cst_8 {dimension_numbers = #tpu.dot_dimension_numbers<[1], [0], [0], [1], [0, 0, 1, 1], [], []>} : vector<128x128xf32>, vector<128x128xf32>, vector<128x128xf32> -> vector<128x128xf32>
    %c0_9 = arith.constant 0 : index
    %c0_10 = arith.constant 0 : index
    %10 = vector.load %arg5[%c0_9, %c0_10] : memref<1x128xf32, #tpu.memory_space<vmem>>, vector<1x128xf32>
    %11 = vector.broadcast %10 : vector<1x128xf32> to vector<128x128xf32>
    %12 = arith.addf %9, %11 : vector<128x128xf32>
    %13 = math.tanh %12 : vector<128x128xf32>
    %cst_11 = arith.constant 1.000000e+00 : f32
    %14 = vector.broadcast %cst_11 : f32 to vector<128x128xf32>
    %15 = arith.mulf %14, %13 : vector<128x128xf32>
    %c0_12 = arith.constant 0 : index
    %c0_13 = arith.constant 0 : index
    %16 = vector.load %arg6[%c0_12, %c0_13] : memref<128x128xf32, #tpu.memory_space<vmem>>, vector<128x128xf32>
    tpu.vector_store %arg6[%c0_12, %c0_13], %15 {strides = array<i32>} : memref<128x128xf32, #tpu.memory_space<vmem>>, vector<128x128xf32>,
    return
  }
  func.func @transform_0(%arg0: i32) -> (i32, i32) {
    %c0_i32 = arith.constant 0 : i32
    %c0_i32_0 = arith.constant 0 : i32
    return %arg0, %c0_i32 : i32, i32
  }
  func.func @transform_1(%arg0: i32) -> (i32, i32) {
    %c0_i32 = arith.constant 0 : i32
    %c0_i32_0 = arith.constant 0 : i32
    %c0_i32_1 = arith.constant 0 : i32
    return %c0_i32, %c0_i32_0 : i32, i32
  }
  func.func @transform_2(%arg0: i32) -> (i32, i32) {
    %c0_i32 = arith.constant 0 : i32
    %c0_i32_0 = arith.constant 0 : i32
    %c0_i32_1 = arith.constant 0 : i32
    return %c0_i32, %c0_i32_0 : i32, i32
  }
  func.func @transform_3(%arg0: i32) -> (i32, i32) {
    %c0_i32 = arith.constant 0 : i32
    %c0_i32_0 = arith.constant 0 : i32
    %c0_i32_1 = arith.constant 0 : i32
    return %c0_i32, %c0_i32_0 : i32, i32
  }
  func.func @transform_4(%arg0: i32) -> (i32, i32) {
    %c0_i32 = arith.constant 0 : i32
    %c0_i32_0 = arith.constant 0 : i32
    %c0_i32_1 = arith.constant 0 : i32
    return %c0_i32, %c0_i32_0 : i32, i32
  }
  func.func @transform_5(%arg0: i32) -> (i32, i32) {
    %c0_i32 = arith.constant 0 : i32
    %c0_i32_0 = arith.constant 0 : i32
    return %arg0, %c0_i32 : i32, i32
  }
}

</mosaic_0001>

<bundles_post_ra>
// kernel: tpu_custom_call.1
= control target key start
LH: loop header
LB: loop body
LE: loop exit
PB: predicated region body
PF: predicated region fallthrough
CT: control target
= control target key end

     0   :  { %10 = vsyncpa [#allocation3], 0  ;;  %s1352_s0 = inlined_call_operand.vmem [shape: f32[256,32], index: 0, kind: input, shape index: {}]   ;;  %s1353_s1 = inlined_call_operand.vmem [shape: f32[32,128], index: 1, kind: input, shape index: {}]   ;;  %s1354_s2 = inlined_call_operand.vmem [shape: f32[1,128], index: 2, kind: input, shape index: {}]   ;;  %s1355_s3 = inlined_call_operand.vmem [shape: f32[128,128], index: 3, kind: input, shape index: {}]   ;;  %s1356_s4 = inlined_call_operand.vmem [shape: f32[1,128], index: 4, kind: input, shape index: {}]   ;;  %s1357_s5 = inlined_call_operand.hbm [shape: f32[256,128], index: 5, kind: output, shape index: {}]  }
   0x1   :  { %12 = vsyncpa [#allocation3 + $0x1], 0  ;;  %s1110_s18 = smov 0   ;;  %s1112_s19 = smov 0  }
   0x2   :  { %s1114_s20 = smov 0   ;;  %s1116_s21 = smov 0  }
   0x3 LB: > { %s1131_s22 = sadd.s32 4294967295, %s1075_s21   ;;  %s739_s23 = sadd.s32 4294967294, %s1075_s21   ;;  %s1075_s21 = sphi %s1116_s21, %s1363_s21   ;;  %s1071_s20 = sphi %s1114_s20, %s1362_s20   ;;  %s1067_s19 = sphi %s1112_s19, %s1361_s19   ;;  %s1063_s18 = sphi %s1110_s18, %s1360_s18  }
   0x4   : > { %s1135_s24 = sadd.s32 1, %s1075_s21   ;;  %s135_s25 = sadd.s32 1, %s1071_s20 }
   0x5   : > { %s132_s26 = ssub.s32 %s1075_s21, %s1135_s24  ;;  %p145_p0 = scmp.ne.s32.totalorder %s1071_s20, %s1067_s19 }
   0x6   : > { %p133_p1 = scmp.eq.s32.totalorder %s132_s26, 0  ;;  %p146_p2 = scmp.eq.s32.totalorder %s1131_s22, 1 }
   0x7   : > { %p151_p3 = scmp.ne.s32.totalorder %s1067_s19, %s1063_s18  ;;  %p152_p4 = scmp.eq.s32.totalorder %s739_s23, 1 }
   0x8   : > { %s1146_s27 = scalar_select %p133_p1, %s1071_s20, %s135_s25  }
   0x9   : > { %p1148_p5 = por %p146_p2, %p145_p0  ;;  %p1152_p6 = por %p152_p4, %p151_p3 }
   0xa   : > { %p742_p7 = scmp.ge.s32.totalorder %s1075_s21, 1  ;;  %p191_p8 = scmp.lt.s32.totalorder %s1075_s21, 3 }
   0xc   : > { %p192_p9 = pnand %p742_p7, %p191_p8 }
   0xd   : > { %s744_s9 = sshll.u32 (!%p192_p9), %s1131_s22, 4  ;;  %s216_s6 = sand.u32 (!%p192_p9), 1, %s1067_s19  }
   0xe   : > { %195 = sbr.rel (%p192_p9) target bundleno = 481 (0x1e1), region = 40  ;;  %p220_p10 = scmp.lt.s32.totalorder (!%p192_p9), %s744_s9, 31 }
   0xf   : > { %s743_s8 = sshll.u32 (!%p192_p9), %s216_s6, 7  ;;  %s769_s10 = sshll.u32 (!%p192_p9), %s1131_s22, 11 }
  0x10   : > { %s1304_s14 = scalar_lea.hbm (!%p192_p9), %s1357_s5, %s769_s10  ;;  %s1077_s15 = smov (!%p192_p9), [#allocation2]  }
  0x11   : > { %s1019_s16 = sshll.u32 (!%p192_p9), %s1077_s15, 4  ;;  %s1020_s16 = int_to_ptr.vmem [resolvable:$false] %s1019_s16 }
  0x12   : > { %s1021_s17 = scalar_lea.vmem (!%p192_p9), %s1020_s16, 4096 }
  0x13   : > { %v245_v0 = vld [vmem:[%s1353_s1 + $0x18] sm:$0xff]  ;;  %v244_v1 = vld [vmem:[%s1353_s1 + $0x10] sm:$0xff]  ;;  %v243_v3 = vld [vmem:[%s1353_s1 + $0x8] sm:$0xff]  ;;  %s1365_s9 = smov (!%p220_p10, %s744_s9), 31  ;;  %vm253_vm0 = vcmask 261120  }
  0x14   : > { %822 = vmatprep.subr.mxu0 %v245_v0  ;;  %v478_v2 = vld [vmem:[%s1355_s3 + $0x78] sm:$0xff]  ;;  %v477_v4 = vld [vmem:[%s1355_s3 + $0x70] sm:$0xff]  ;;  %v242_v5 = vld [vmem:[%s1353_s1] sm:$0xff]  ;;  %s745_s23 = sshll.u32 %s1365_s9, 3  ;;  %s1275_s9 = scalar_lea.vmem [#allocation2], %s743_s8 }
  0x15   : > { %823 = vmatpush3.msra.mxu0 %v245_v0  ;;  %910 = vmatprep.subr.mxu1 %v478_v2  ;;  %v476_v6 = vld [vmem:[%s1355_s3 + $0x68] sm:$0xff]  ;;  %s1183_s7 = scalar_lea.vmem %s1352_s0, %s745_s23  ;;  %v475_v11 = vld [vmem:[%s1355_s3 + $0x60] sm:$0xff]  ;;  %v474_v14 = vld [vmem:[%s1355_s3 + $0x58] sm:$0xff]  ;;  %s677_s11 = sshll.u32 %s1275_s9, 4  ;;  %s1306_s11 = int_to_ptr.vmem [resolvable:$true] %s677_s11 }
  0x16   : > { %824 = vmatprep.subr.mxu0 %v244_v1  ;;  %926 = vmatpush3.msra.mxu1 %v478_v2  ;;  %v226_v7 = vld [vmem:[%s1183_s7] sm:$0xff]  ;;  %v227_v8 = vld [vmem:[%s1183_s7 + $0x8] sm:$0xff]  ;;  %v228_v9 = vld [vmem:[%s1183_s7 + $0x10] sm:$0xff]  ;;  %s1015_s22 = scalar_lea.vmem %s1306_s11, 2048  ;;  %p1022_p0 = scmp.lt.s32.totalorder %s1306_s11, %s1020_s16 }
  0x17   : > { %825 = vmatpush3.msra.mxu0 %v244_v1  ;;  %911 = vmatprep.subr.mxu1 %v477_v4  ;;  %v229_v10 = vld [vmem:[%s1183_s7 + $0x18] sm:$0xff]  ;;  %v230_v12 = vld [vmem:[%s1183_s7 + $0x20] sm:$0xff]  ;;  %v231_v13 = vld [vmem:[%s1183_s7 + $0x28] sm:$0xff]  ;;  %p1016_p11 = scmp.ne.s32.totalorder %s1306_s11, %s1015_s22  ;;  %p1023_p1 = scmp.lt.s32.totalorder %s1021_s17, %s1015_s22 }
  0x18   : > { %826 = vmatprep.subr.mxu0 %v243_v3  ;;  %927 = vmatpush3.msra.mxu1 %v477_v4  ;;  %v232_v15 = vld [vmem:[%s1183_s7 + $0x30] sm:$0xff]  ;;  %v233_v17 = vld [vmem:[%s1183_s7 + $0x38] sm:$0xff]  ;;  %v472_v18 = vld [vmem:[%s1355_s3 + $0x48] sm:$0xff] }
  0x19   : > { %827 = vmatpush3.msra.mxu0 %v243_v3  ;;  %912 = vmatprep.subr.mxu1 %v476_v6  ;;  %v473_v16 = vld [vmem:[%s1355_s3 + $0x50] sm:$0xff]  ;;  %v234_v19 = vld [vmem:[%s1183_s7 + $0x40] sm:$0xff]  ;;  %v235_v21 = vld [vmem:[%s1183_s7 + $0x48] sm:$0xff]  ;;  %p1017_p12 = pnand %p1016_p11, %p1148_p5  ;;  %p1024_p2 = por %p1023_p1, %p1022_p0 }
  0x1a   : > { %828 = vmatprep.subr.mxu0 %v242_v5  ;;  %928 = vmatpush3.msra.mxu1 %v476_v6  ;;  %v471_v20 = vld [vmem:[%s1355_s3 + $0x40] sm:$0xff]  ;;  %v470_v22 = vld [vmem:[%s1355_s3 + $0x38] sm:$0xff]  ;;  %v236_v23 = vld [vmem:[%s1183_s7 + $0x50] sm:$0xff] }
  0x1b   : > { %829 = vmatpush3.msra.mxu0 %v242_v5  ;;  %830 = vmatprep.mubr.msk.f32.mxu0 %vm253_vm0, %v226_v7  ;;  %v469_v24 = vld [vmem:[%s1355_s3 + $0x30] sm:$0xff]  ;;  %v237_v25 = vld [vmem:[%s1183_s7 + $0x58] sm:$0xff]  ;;  %v468_v26 = vld [vmem:[%s1355_s3 + $0x28] sm:$0xff]  ;;  %p1018_p13 = pneg %p1017_p12 }
  0x1c   : > { %831 = vmatmul.mubr.msk.f32.vlgmr.msra.gmra.mxu0 %vm253_vm0, %v227_v8  ;;  %854 = vmatprep.subr.mxu0 %v478_v2  ;;  %v238_v27 = vld [vmem:[%s1183_s7 + $0x60] sm:$0xff]  ;;  %v239_v29 = vld [vmem:[%s1183_s7 + $0x68] sm:$0xff]  ;;  %v240_v30 = vld [vmem:[%s1183_s7 + $0x70] sm:$0xff] }
  0x1d   : > { %833 = vmatprep.mubr.msk.f32.mxu0 %vm253_vm0, %v228_v9  ;;  %855 = vmatpush3.msra.mxu0 %v478_v2  ;;  %v467_v28 = vld [vmem:[%s1355_s3 + $0x20] sm:$0xff]  ;;  %v241_v31 = vld [vmem:[%s1183_s7 + $0x78] sm:$0xff]  ;;  %v465_v33 = vld [vmem:[%s1355_s3 + $0x10] sm:$0xff]  ;;  %s1312_s7 = scalar_lea.sflag [#allocation3], %s216_s6  ;;  %p1025_p3 = pnand %p1024_p2, %p1018_p13 }
  0x1e   : > { %856 = vmatprep.subr.mxu0 %v477_v4  ;;  %913 = vmatprep.subr.mxu1 %v475_v11  ;;  %v466_v32 = vld [vmem:[%s1355_s3 + $0x18] sm:$0xff]  ;;  %v464_v34 = vld [vmem:[%s1355_s3 + $0x8] sm:$0xff]  ;;  %v463_v35 = vld [vmem:[%s1355_s3] sm:$0xff] }
  0x1f   : > { %857 = vmatpush3.msra.mxu0 %v477_v4  ;;  %929 = vmatpush3.msra.mxu1 %v475_v11  ;;  %v746_v36 = vld [vmem:[%s1354_s2] ss:$0 sm:$0xff] }
  0x20   : > { %834 = vmatmul.mubr.msk.f32.gmra.mxu0 %vm253_vm0, %v229_v10  ;;  %858 = vmatprep.subr.mxu0 %v476_v6 }
  0x21   : > { %836 = vmatprep.mubr.msk.f32.mxu0 %vm253_vm0, %v230_v12  ;;  %859 = vmatpush3.msra.mxu0 %v476_v6 }
  0x22   : > { %860 = vmatprep.subr.mxu0 %v475_v11  ;;  %914 = vmatprep.subr.mxu1 %v474_v14 }
  0x23   : > { %861 = vmatpush3.msra.mxu0 %v475_v11  ;;  %930 = vmatpush3.msra.mxu1 %v474_v14 }
  0x24   : > { %837 = vmatmul.mubr.msk.f32.gmra.mxu0 %vm253_vm0, %v231_v13  ;;  %862 = vmatprep.subr.mxu0 %v474_v14 }
  0x25   : > { %839 = vmatprep.mubr.msk.f32.mxu0 %vm253_vm0, %v232_v15  ;;  %863 = vmatpush3.msra.mxu0 %v474_v14 }
  0x26   : > { %864 = vmatprep.subr.mxu0 %v473_v16  ;;  %915 = vmatprep.subr.mxu1 %v473_v16 }
  0x27   : > { %865 = vmatpush3.msra.mxu0 %v473_v16  ;;  %931 = vmatpush3.msra.mxu1 %v473_v16 }
  0x28   : > { %840 = vmatmul.mubr.msk.f32.gmra.mxu0 %vm253_vm0, %v233_v17  ;;  %866 = vmatprep.subr.mxu0 %v472_v18 }
  0x29   : > { %842 = vmatprep.mubr.msk.f32.mxu0 %vm253_vm0, %v234_v19  ;;  %867 = vmatpush3.msra.mxu0 %v472_v18 }
  0x2a   : > { %868 = vmatprep.subr.mxu0 %v471_v20  ;;  %916 = vmatprep.subr.mxu1 %v472_v18 }
  0x2b   : > { %869 = vmatpush3.msra.mxu0 %v471_v20  ;;  %932 = vmatpush3.msra.mxu1 %v472_v18 }
  0x2c   : > { %843 = vmatmul.mubr.msk.f32.gmra.mxu0 %vm253_vm0, %v235_v21  ;;  %870 = vmatprep.subr.mxu0 %v470_v22  ;;  %v1262_v21 = vld [vmem:[%s1356_s4] ss:$0 sm:$0xff] }
  0x2d   : > { %845 = vmatprep.mubr.msk.f32.mxu0 %vm253_vm0, %v236_v23  ;;  %871 = vmatpush3.msra.mxu0 %v470_v22 }
  0x2e   : > { %872 = vmatprep.subr.mxu0 %v469_v24  ;;  %917 = vmatprep.subr.mxu1 %v471_v20 }
  0x2f   : > { %873 = vmatpush3.msra.mxu0 %v469_v24  ;;  %933 = vmatpush3.msra.mxu1 %v471_v20 }
  0x30   : > { %846 = vmatmul.mubr.msk.f32.gmra.mxu0 %vm253_vm0, %v237_v25  ;;  %874 = vmatprep.subr.mxu0 %v468_v26 }
  0x31   : > { %848 = vmatprep.mubr.msk.f32.mxu0 %vm253_vm0, %v238_v27  ;;  %875 = vmatpush3.msra.mxu0 %v468_v26 }
  0x32   : > { %876 = vmatprep.subr.mxu0 %v467_v28  ;;  %918 = vmatprep.subr.mxu1 %v470_v22 }
  0x33   : > { %877 = vmatpush3.msra.mxu0 %v467_v28  ;;  %934 = vmatpush3.msra.mxu1 %v470_v22 }
  0x34   : > { %849 = vmatmul.mubr.msk.f32.gmra.mxu0 %vm253_vm0, %v239_v29  ;;  %919 = vmatprep.subr.mxu1 %v469_v24 }
  0x35   : > { %851 = vmatprep.mubr.msk.f32.mxu0 %vm253_vm0, %v240_v30  ;;  %935 = vmatpush3.msra.mxu1 %v469_v24 }
  0x36   : > { %920 = vmatprep.subr.mxu1 %v468_v26  ;;  %878 = vmatprep.subr.mxu0 %v466_v32 }
  0x37   : > { %936 = vmatpush3.msra.mxu1 %v468_v26  ;;  %879 = vmatpush3.msra.mxu0 %v466_v32 }
  0x38   : > { %852 = vmatmul.mubr.msk.f32.gmra.mxu0 %vm253_vm0, %v241_v31  ;;  %921 = vmatprep.subr.mxu1 %v467_v28 }
  0x39   : > { %937 = vmatpush3.msra.mxu1 %v467_v28  ;;  %880 = vmatprep.subr.mxu0 %v465_v33 }
  0x3a   : > { %922 = vmatprep.subr.mxu1 %v466_v32  ;;  %881 = vmatpush3.msra.mxu0 %v465_v33 }
  0x3b   : > { %938 = vmatpush3.msra.mxu1 %v466_v32  ;;  %882 = vmatprep.subr.mxu0 %v464_v34 }
  0x3c   : > { %923 = vmatprep.subr.mxu1 %v465_v33  ;;  %883 = vmatpush3.msra.mxu0 %v464_v34 }
  0x3d   : > { %939 = vmatpush3.msra.mxu1 %v465_v33  ;;  %884 = vmatprep.subr.mxu0 %v463_v35 }
  0x3e   : > { %924 = vmatprep.subr.mxu1 %v464_v34  ;;  %885 = vmatpush3.msra.mxu0 %v463_v35 }
  0x3f   : > { %940 = vmatpush3.msra.mxu1 %v464_v34 }
  0x40   : > { %925 = vmatprep.subr.mxu1 %v463_v35 }
  0x41   : > { %941 = vmatpush3.msra.mxu1 %v463_v35 }
  0xdc   : > { %v832_v37 = vpop.f32.mrf.mxu0 }
  0xdd   : > { %v374_v38 = vadd.f32 %v832_v37, %v746_v36 }
  0xde   : > { %v368_v39 = vpop.f32.mrf.mxu0 }
  0xdf   : > { %v369_v40 = vadd.f32 %v746_v36, %v368_v39  ;;  %v448_v43 = vmax.f32 %v374_v38, 0.0 }
  0xe0   : > { %v835_v41 = vpop.f32.mrf.mxu0 }
  0xe1   : > { %v447_v42 = vmax.f32 %v369_v40, 0.0  ;;  %v384_v44 = vadd.f32 %v835_v41, %v746_v36 }
  0xe2   : > { %v378_v45 = vpop.f32.mrf.mxu0 }
  0xe3   : > { %v379_v46 = vadd.f32 %v746_v36, %v378_v45  ;;  %886 = vmatprep.mubr.f32.mxu0 %v447_v42  ;;  %v450_v49 = vmax.f32 %v384_v44, 0.0 }
  0xe4   : > { %v838_v47 = vpop.f32.mrf.mxu0  ;;  %887 = vmatmul.mubr.f32.vlgmr.msra.gmra.mxu0 %v448_v43 }
  0xe5   : > { %v449_v48 = vmax.f32 %v379_v46, 0.0  ;;  %v394_v50 = vadd.f32 %v838_v47, %v746_v36 }
  0xe6   : > { %v388_v51 = vpop.f32.mrf.mxu0 }
  0xe7   : > { %v389_v52 = vadd.f32 %v746_v36, %v388_v51  ;;  %889 = vmatprep.mubr.f32.mxu0 %v449_v48  ;;  %v452_v55 = vmax.f32 %v394_v50, 0.0 }
  0xe8   : > { %v841_v53 = vpop.f32.mrf.mxu0  ;;  %890 = vmatmul.mubr.f32.gmra.mxu0 %v450_v49 }
  0xe9   : > { %v451_v54 = vmax.f32 %v389_v52, 0.0  ;;  %v404_v56 = vadd.f32 %v841_v53, %v746_v36 }
  0xea   : > { %v398_v57 = vpop.f32.mrf.mxu0 }
  0xeb   : > { %892 = vmatprep.mubr.f32.mxu0 %v451_v54  ;;  %v399_v58 = vadd.f32 %v746_v36, %v398_v57  ;;  %v454_v61 = vmax.f32 %v404_v56, 0.0 }
  0xec   : > { %v844_v59 = vpop.f32.mrf.mxu0  ;;  %893 = vmatmul.mubr.f32.gmra.mxu0 %v452_v55 }
  0xed   : > { %v453_v60 = vmax.f32 %v399_v58, 0.0  ;;  %v414_v62 = vadd.f32 %v844_v59, %v746_v36 }
  0xee   : > { %v408_v63 = vpop.f32.mrf.mxu0 }
  0xef   : > { %v409_v0 = vadd.f32 %v746_v36, %v408_v63  ;;  %895 = vmatprep.mubr.f32.mxu1 %v453_v60  ;;  %v456_v3 = vmax.f32 %v414_v62, 0.0 }
  0xf0   : > { %v847_v1 = vpop.f32.mrf.mxu0  ;;  %896 = vmatmul.mubr.f32.vlgmr.msra.gmra.mxu1 %v454_v61 }
  0xf1   : > { %v455_v2 = vmax.f32 %v409_v0, 0.0  ;;  %v424_v4 = vadd.f32 %v847_v1, %v746_v36 }
  0xf2   : > { %v418_v5 = vpop.f32.mrf.mxu0 }
  0xf3   : > { %v419_v6 = vadd.f32 %v746_v36, %v418_v5  ;;  %898 = vmatprep.mubr.f32.mxu1 %v455_v2  ;;  %v458_v9 = vmax.f32 %v424_v4, 0.0 }
  0xf4   : > { %v850_v7 = vpop.f32.mrf.mxu0  ;;  %899 = vmatmul.mubr.f32.gmra.mxu1 %v456_v3 }
  0xf5   : > { %v457_v8 = vmax.f32 %v419_v6, 0.0  ;;  %v434_v10 = vadd.f32 %v850_v7, %v746_v36 }
  0xf6   : > { %v428_v11 = vpop.f32.mrf.mxu0 }
  0xf7   : > { %v429_v12 = vadd.f32 %v746_v36, %v428_v11  ;;  %901 = vmatprep.mubr.f32.mxu1 %v457_v8  ;;  %v460_v15 = vmax.f32 %v434_v10, 0.0 }
  0xf8   : > { %v853_v13 = vpop.f32.mrf.mxu0  ;;  %902 = vmatmul.mubr.f32.gmra.mxu1 %v458_v9 }
  0xf9   : > { %v459_v14 = vmax.f32 %v429_v12, 0.0  ;;  %v444_v16 = vadd.f32 %v853_v13, %v746_v36 }
  0xfa   : > { %v438_v17 = vpop.f32.mrf.mxu0 }
  0xfb   : > { %v439_v18 = vadd.f32 %v746_v36, %v438_v17  ;;  %904 = vmatprep.mubr.f32.mxu1 %v459_v14  ;;  %v462_v20 = vmax.f32 %v444_v16, 0.0 }
  0xfc   : > { %905 = vmatmul.mubr.f32.gmra.mxu1 %v460_v15 }
  0xfd   : > { %v461_v19 = vmax.f32 %v439_v18, 0.0 }
  0xff   : > { %907 = vmatprep.mubr.f32.mxu1 %v461_v19 }
 0x100   : > { %908 = vmatmul.mubr.f32.gmra.mxu1 %v462_v20 }
 0x1a4   : > { %v888_v22 = vpop.f32.mrf.mxu0 }
 0x1a5   : > { %v558_v23 = vadd.f32 %v888_v22, %v1262_v21 }
 0x1a6   : > { %v552_v24 = vpop.f32.mrf.mxu0 }
 0x1a7   : > { %983 = vtanh.f32 %v558_v23  ;;  %v553_v25 = vadd.f32 %v1262_v21, %v552_v24 }
 0x1a8   : > { %v891_v26 = vpop.f32.mrf.mxu0 }
 0x1a9   : > { %985 = vtanh.f32 %v553_v25  ;;  %v568_v27 = vadd.f32 %v891_v26, %v1262_v21 }
 0x1aa   : > { %v562_v28 = vpop.f32.mrf.mxu0 }
 0x1ab   : > { %987 = vtanh.f32 %v568_v27  ;;  %v563_v29 = vadd.f32 %v1262_v21, %v562_v28 }
 0x1ac   : > { %v894_v30 = vpop.f32.mrf.mxu0 }
 0x1ad   : > { %989 = vtanh.f32 %v563_v29  ;;  %v578_v31 = vadd.f32 %v894_v30, %v1262_v21 }
 0x1ae   : > { %v572_v32 = vpop.f32.mrf.mxu0 }
 0x1af   : > { %991 = vtanh.f32 %v578_v31  ;;  %v573_v33 = vadd.f32 %v1262_v21, %v572_v32 }
 0x1b0   : > { %v897_v34 = vpop.f32.mrf.mxu1 }
 0x1b1   : > { %993 = vtanh.f32 %v573_v33  ;;  %v588_v35 = vadd.f32 %v897_v34, %v1262_v21 }
 0x1b2   : > { %v582_v36 = vpop.f32.mrf.mxu1 }
 0x1b3   : > { %995 = vtanh.f32 %v588_v35  ;;  %v583_v37 = vadd.f32 %v1262_v21, %v582_v36 }
 0x1b4   : > { %v984_v38 = vpop.eup %983  ;;  %v900_v39 = vpop.f32.mrf.mxu1 }
 0x1b5   : > { %648 = vst [vmem:[%s1275_s9 + $0x8] sm:$0xff] %v984_v38  ;;  %997 = vtanh.f32 %v583_v37  ;;  %v598_v40 = vadd.f32 %v900_v39, %v1262_v21 }
 0x1b6   : > { %v986_v41 = vpop.eup %985  ;;  %v592_v42 = vpop.f32.mrf.mxu1 }
 0x1b7   : > { %647 = vst [vmem:[%s1275_s9] sm:$0xff] %v986_v41  ;;  %999 = vtanh.f32 %v598_v40  ;;  %v593_v43 = vadd.f32 %v1262_v21, %v592_v42 }
 0x1b8   : > { %v988_v44 = vpop.eup %987  ;;  %v903_v45 = vpop.f32.mrf.mxu1 }
 0x1b9   : > { %650 = vst [vmem:[%s1275_s9 + $0x18] sm:$0xff] %v988_v44  ;;  %1001 = vtanh.f32 %v593_v43  ;;  %v608_v46 = vadd.f32 %v903_v45, %v1262_v21 }
 0x1ba   : > { %v990_v47 = vpop.eup %989  ;;  %v602_v48 = vpop.f32.mrf.mxu1 }
 0x1bb   : > { %649 = vst [vmem:[%s1275_s9 + $0x10] sm:$0xff] %v990_v47  ;;  %1003 = vtanh.f32 %v608_v46  ;;  %v603_v49 = vadd.f32 %v1262_v21, %v602_v48 }
 0x1bc   : > { %v992_v50 = vpop.eup %991  ;;  %v906_v51 = vpop.f32.mrf.mxu1 }
 0x1bd   : > { %652 = vst [vmem:[%s1275_s9 + $0x28] sm:$0xff] %v992_v50  ;;  %1005 = vtanh.f32 %v603_v49  ;;  %v618_v52 = vadd.f32 %v906_v51, %v1262_v21 }
 0x1be   : > { %v994_v53 = vpop.eup %993  ;;  %v612_v54 = vpop.f32.mrf.mxu1 }
 0x1bf   : > { %651 = vst [vmem:[%s1275_s9 + $0x20] sm:$0xff] %v994_v53  ;;  %1007 = vtanh.f32 %v618_v52  ;;  %v613_v55 = vadd.f32 %v1262_v21, %v612_v54 }
 0x1c0   : > { %v996_v56 = vpop.eup %995  ;;  %v909_v57 = vpop.f32.mrf.mxu1 }
 0x1c1   : > { %654 = vst [vmem:[%s1275_s9 + $0x38] sm:$0xff] %v996_v56  ;;  %1009 = vtanh.f32 %v613_v55  ;;  %v628_v58 = vadd.f32 %v909_v57, %v1262_v21 }
 0x1c2   : > { %v998_v59 = vpop.eup %997  ;;  %v622_v60 = vpop.f32.mrf.mxu1 }
 0x1c3   : > { %653 = vst [vmem:[%s1275_s9 + $0x30] sm:$0xff] %v998_v59  ;;  %1011 = vtanh.f32 %v628_v58  ;;  %v623_v61 = vadd.f32 %v1262_v21, %v622_v60 }
 0x1c4   : > { %v1000_v62 = vpop.eup %999 }
 0x1c5   : > { %656 = vst [vmem:[%s1275_s9 + $0x48] sm:$0xff] %v1000_v62  ;;  %1013 = vtanh.f32 %v623_v61 }
 0x1c6   : > { %v1002_v63 = vpop.eup %1001 }
 0x1c7   : > { %655 = vst [vmem:[%s1275_s9 + $0x40] sm:$0xff] %v1002_v63 }
 0x1c8   : > { %v1004_v0 = vpop.eup %1003 }
 0x1c9   : > { %658 = vst [vmem:[%s1275_s9 + $0x58] sm:$0xff] %v1004_v0 }
 0x1ca   : > { %v1006_v1 = vpop.eup %1005 }
 0x1cb   : > { %657 = vst [vmem:[%s1275_s9 + $0x50] sm:$0xff] %v1006_v1 }
 0x1cc   : > { %v1008_v2 = vpop.eup %1007 }
 0x1cd   : > { %660 = vst [vmem:[%s1275_s9 + $0x68] sm:$0xff] %v1008_v2 }
 0x1ce   : > { %v1010_v3 = vpop.eup %1009 }
 0x1cf   : > { %659 = vst [vmem:[%s1275_s9 + $0x60] sm:$0xff] %v1010_v3 }
 0x1d0   : > { %v1012_v4 = vpop.eup %1011 }
 0x1d1   : > { %662 = vst [vmem:[%s1275_s9 + $0x78] sm:$0xff] %v1012_v4 }
 0x1d2   : > { %v1014_v5 = vpop.eup %1013 }
 0x1d3   : > { %661 = vst [vmem:[%s1275_s9 + $0x70] sm:$0xff] %v1014_v5 }
 0x1d4   : > { %1028 = shalt.err (!%p1025_p3)
}
 0x1d5   : > { %s1029_s23 = scalar_lea.hbm %s1304_s14, 2048  ;;  %s1033_s30 = scalar_lea.hbm %s1357_s5, 4096 }
 0x1d6   : > { %p1030_p4 = scmp.ne.s32.totalorder %s1304_s14, %s1029_s23  ;;  %p1034_p9 = scmp.lt.s32.totalorder %s1304_s14, %s1357_s5 }
 0x1d7   : > { %p1035_p10 = scmp.lt.s32.totalorder %s1033_s30, %s1029_s23 }
 0x1d8   : > { %p1031_p7 = pnand %p1030_p4, %p1148_p5 }
 0x1d9   : > { %p1036_p11 = por %p1035_p10, %p1034_p9 }
 0x1da   : > { %p1032_p8 = pneg %p1031_p7 }
 0x1dc   : > { %p1037_p12 = pnand %p1036_p11, %p1032_p8 }
 0x1de   : > { %1040 = shalt.err (!%p1037_p12)
}
 0x1df   : > { %s1078_s9 = smov 128   ;;  %s1079_s10 = smov 8  }
 0x1e0   : > { %942 = dma.vmem_to_hbm [thread:$0]  (%p1148_p5), %s1306_s11, 2048, %s1304_s14, %s1312_s7, %s1078_s9, %s1078_s9, %s1079_s10  }
 0x1e1 PF: > { %p948_p13 = scmp.ge.s32.totalorder %s1075_s21, 2  ;;  %s692_s12 = sand.u32 1, %s1063_s18  }
 0x1e2   : > { %s693_s13 = scalar_lea.sflag [#allocation3], %s692_s12 }
 0x1e3   : > { %p945_p0 = pnand %p948_p13, %p1152_p6 }
 0x1e5   : > { %p946_p1 = pneg %p945_p0 }
 0x1e7   : > { %1058 = dma.done.wait (%p946_p1), %s693_s13, 2048  }
 0x1e8   : > { %1060 = vsyncadd (%p946_p1), %s693_s13, 4294965248  ;;  %p15_p2 = scmp.ge.s32.totalorder %s1135_s24, 4   ;;  %s1360_s18 = smov %s1067_s19 }
 0x1e9   : > { %s1361_s19 = smov %s1071_s20  ;;  %s1362_s20 = smov %s1146_s27 }
 0x1ea   : > { %s1363_s21 = smov %s1135_s24  ;;  %17 = sbr.rel (!%p15_p2) target bundleno = 3 (0x3), region = 75 }
 0x1ef   :  { %698 = vsyncpa [#allocation3], 1 }
 0x1f0   :  { %700 = vsyncpa [#allocation3 + $0x1], 1 }

</bundles_post_ra>
